<compile_context>
chip_gen: v7x
topology: tpu7x:2x2x1
jax: 0.10.0
libtpu: 0.0.40
codegen_flags: <defaults>
</compile_context>

<pallas_src>
import jax
import jax.numpy as jnp
from jax.experimental import pallas as pl
from jax.experimental.pallas import tpu as pltpu


def _featavgpool_kernel(x_ref, w_ref, b_ref, p_ref, o_ref):
    # x_ref: (TILE_T, Cin)     bf16 input rows for this (batch, time-tile)
    # w_ref: (Cin, H)          bf16 pointwise-conv weight (k=1 conv == matmul)
    # b_ref: (1, H)            f32 conv bias
    # p_ref: (TO_TILE, TILE_T) f32 constant averaging matrix
    # o_ref: (TO_TILE, H)      f32 pooled output tile (lane-dense, H last)
    y = jnp.dot(x_ref[...], w_ref[...], preferred_element_type=jnp.float32)
    y = jnp.maximum(y + b_ref[...], 0.0)
    o_ref[...] = jnp.dot(p_ref[...], y,
                         preferred_element_type=jnp.float32).astype(o_ref.dtype)


def _choose_tiles(T, T_out, Cin, H, kernel_size, stride):
    """Pick (to_tile, tile_t, grid_t) for the output-time tiling."""
    if kernel_size > stride:
        # TODO(synk): add a (kernel_size - stride)-row halo so T can be tiled
        # when pooling windows overlap; fall back to a single full-T tile.
        return T_out, T, 1
    if T_out <= 8:
        return T_out, T, 1

    def footprint(to):
        tt = to * stride
        return (2 * tt * Cin * 2      # double-buffered bf16 x blocks
                + 2 * to * H * 4      # double-buffered f32 output blocks
                + 2 * to * tt * 4     # pooling matrix
                + 2 * Cin * H * 2)    # bf16 weights

    budget = 8 * 1024 * 1024          # stay well under v7x's 64 MiB VMEM
    to_tile = max(8, (min(T_out, 256) // 8) * 8)
    while to_tile > 8 and footprint(to_tile) > budget:
        to_tile -= 8
    if to_tile >= T_out:
        return T_out, T, 1
    grid_t = -(-T_out // to_tile)     # cdiv
    return to_tile, to_tile * stride, grid_t


def feat_avg_pool(x, weight, bias, *, kernel_size, stride):
    """x: (B, T, C_in); weight: (hidden, C_in) (Conv1d weight squeezed); bias: (hidden,).

    Returns (B, hidden, T_out), T_out = (T - kernel_size) // stride + 1,
    matching PyTorch FeatAvgPool.forward (NCW output).
    """
    B, T, Cin = x.shape
    H = weight.shape[0]
    T_out = (T - kernel_size) // stride + 1
    if T_out <= 0:
        raise ValueError("T must be >= kernel_size (T_out would be 0)")

    to_tile, tile_t, grid_t = _choose_tiles(T, T_out, Cin, H, kernel_size, stride)

    # bf16 for the HBM / MXU streams; epilogue stays f32.
    x_b = x.astype(jnp.bfloat16)
    if grid_t * tile_t > T:           # zero-pad T so every input block is in-bounds
        x_b = jnp.pad(x_b, ((0, 0), (0, grid_t * tile_t - T), (0, 0)))
    w_t = jnp.asarray(weight, jnp.bfloat16).T            # (Cin, H)
    b2d = jnp.asarray(bias, jnp.float32).reshape(1, H)   # (1, H)

    # Constant averaging matrix: pooled = P @ relu(x @ W + b)   (local windows)
    rows = jnp.arange(to_tile, dtype=jnp.int32)[:, None] * stride
    cols = jnp.arange(tile_t, dtype=jnp.int32)[None, :]
    pmat = jnp.where((cols >= rows) & (cols < rows + kernel_size),
                     jnp.float32(1.0 / kernel_size), jnp.float32(0.0))

    out = pl.pallas_call(
        _featavgpool_kernel,
        out_shape=jax.ShapeDtypeStruct((B, T_out, H), jnp.float32),
        grid_spec=pltpu.PrefetchScalarGridSpec(
            num_scalar_prefetch=0,
            grid=(B, grid_t),
            in_specs=[
                pl.BlockSpec((pl.Squeezed(), tile_t, Cin), lambda b, t: (b, t, 0)),
                pl.BlockSpec((Cin, H), lambda b, t: (0, 0)),
                pl.BlockSpec((1, H), lambda b, t: (0, 0)),
                pl.BlockSpec((to_tile, tile_t), lambda b, t: (0, 0)),
            ],
            out_specs=pl.BlockSpec((pl.Squeezed(), to_tile, H),
                                   lambda b, t: (b, t, 0)),
        ),
        compiler_params=pltpu.CompilerParams(
            dimension_semantics=("parallel", "parallel"),
            vmem_limit_bytes=32 * 1024 * 1024,
        ),
    )(x_b, w_t, b2d, pmat)

    # Single cheap XLA transpose to PyTorch's NCW layout.
    return jnp.transpose(out, (0, 2, 1))


if __name__ == "__main__":
    # small shapes consistent with the module
    B, T, INPUT_SIZE, HIDDEN_SIZE = 2, 16, 32, 32
    KERNEL_SIZE, STRIDE = 2, 2

    key = jax.random.PRNGKey(0)
    kx, kw, kb = jax.random.split(key, 3)
    x = jax.random.normal(kx, (B, T, INPUT_SIZE), jnp.float32)
    # Conv1d weight is (H, Cin, 1) -> squeezed to (H, Cin)
    weight = jax.random.normal(kw, (HIDDEN_SIZE, INPUT_SIZE), jnp.float32) * 0.1
    bias = jax.random.normal(kb, (HIDDEN_SIZE,), jnp.float32) * 0.1

    out = feat_avg_pool(x, weight, bias, kernel_size=KERNEL_SIZE, stride=STRIDE)
    out = jax.block_until_ready(out)

    # pure-JAX reference (same bf16 rounding of the MXU inputs as the kernel)
    xb = x.astype(jnp.bfloat16).astype(jnp.float32)
    wb = weight.astype(jnp.bfloat16).astype(jnp.float32)
    y_ref = jnp.maximum(jnp.einsum("btc,hc->bth", xb, wb) + bias, 0.0)  # (B,T,H)
    T_out = (T - KERNEL_SIZE) // STRIDE + 1
    pooled_ref = jnp.stack(
        [y_ref[:, to * STRIDE: to * STRIDE + KERNEL_SIZE, :].mean(axis=1)
         for to in range(T_out)], axis=1)                               # (B,T_out,H)
    ref = jnp.transpose(pooled_ref, (0, 2, 1))                          # (B,H,T_out)

    assert out.shape == (B, HIDDEN_SIZE, T_out)
    assert jnp.allclose(out, ref, atol=1e-4, rtol=1e-4)
    print("KERNEL_OK")
</pallas_src>

<mosaic_0001>
module attributes {stable_mosaic.version = 11 : i64} {
  func.func @_featavgpool_kernel(%arg0: i32, %arg1: i32, %arg2: memref<1x16x32xbf16, #tpu.memory_space<vmem>>, %arg3: memref<32x32xbf16, #tpu.memory_space<vmem>>, %arg4: memref<1x32xf32, #tpu.memory_space<vmem>>, %arg5: memref<8x16xf32, #tpu.memory_space<vmem>>, %arg6: memref<1x8x32xf32, #tpu.memory_space<vmem>>) attributes {dimension_semantics = [#tpu.dimension_semantics<parallel>, #tpu.dimension_semantics<parallel>], iteration_bounds = array<i64: 2, 1>, scalar_prefetch = 0 : i64, scratch_operands = 0 : i64, tpu.core_type = #tpu.core_type<tc>, window_params = [{transform_indices = @transform_0, window_bounds = array<i64: 1, 16, 32>}, {pipeline_mode = #tpu.pipeline_mode<synchronous>, transform_indices = @transform_1, window_bounds = array<i64: 32, 32>}, {pipeline_mode = #tpu.pipeline_mode<synchronous>, transform_indices = @transform_2, window_bounds = array<i64: 1, 32>}, {pipeline_mode = #tpu.pipeline_mode<synchronous>, transform_indices = @transform_3, window_bounds = array<i64: 8, 16>}, {transform_indices = @transform_4, window_bounds = array<i64: 1, 8, 32>}]} {
    %c0 = arith.constant 0 : index
    %c0_0 = arith.constant 0 : index
    %c0_1 = arith.constant 0 : index
    %0 = vector.load %arg2[%c0, %c0_0, %c0_1] : memref<1x16x32xbf16, #tpu.memory_space<vmem>>, vector<1x16x32xbf16>
    %1 = vector.shape_cast %0 : vector<1x16x32xbf16> to vector<16x32xbf16>
    %c0_2 = arith.constant 0 : index
    %c0_3 = arith.constant 0 : index
    %2 = vector.load %arg3[%c0_2, %c0_3] : memref<32x32xbf16, #tpu.memory_space<vmem>>, vector<32x32xbf16>
    %cst = arith.constant dense<0.000000e+00> : vector<16x32xf32>
    %3 = tpu.matmul %1, %2, %cst {dimension_numbers = #tpu.dot_dimension_numbers<[1], [0], [0], [1], [0, 0, 1, 1], [], []>} : vector<16x32xbf16>, vector<32x32xbf16>, vector<16x32xf32> -> vector<16x32xf32>
    %c0_4 = arith.constant 0 : index
    %c0_5 = arith.constant 0 : index
    %4 = vector.load %arg4[%c0_4, %c0_5] : memref<1x32xf32, #tpu.memory_space<vmem>>, vector<1x32xf32>
    %5 = vector.broadcast %4 : vector<1x32xf32> to vector<16x32xf32>
    %6 = arith.addf %3, %5 : vector<16x32xf32>
    %cst_6 = arith.constant 0.000000e+00 : f32
    %7 = vector.broadcast %cst_6 : f32 to vector<16x32xf32>
    %8 = arith.maximumf %6, %7 : vector<16x32xf32>
    %c0_7 = arith.constant 0 : index
    %c0_8 = arith.constant 0 : index
    %9 = vector.load %arg5[%c0_7, %c0_8] : memref<8x16xf32, #tpu.memory_space<vmem>>, vector<8x16xf32>
    %cst_9 = arith.constant dense<0.000000e+00> : vector<8x32xf32>
    %10 = tpu.matmul %9, %8, %cst_9 {dimension_numbers = #tpu.dot_dimension_numbers<[1], [0], [0], [1], [0, 0, 1, 1], [], []>} : vector<8x16xf32>, vector<16x32xf32>, vector<8x32xf32> -> vector<8x32xf32>
    %c0_10 = arith.constant 0 : index
    %c0_11 = arith.constant 0 : index
    %c0_12 = arith.constant 0 : index
    %11 = vector.load %arg6[%c0_10, %c0_11, %c0_12] : memref<1x8x32xf32, #tpu.memory_space<vmem>>, vector<1x8x32xf32>
    %12 = vector.shape_cast %11 : vector<1x8x32xf32> to vector<8x32xf32>
    %13 = vector.shape_cast %10 : vector<8x32xf32> to vector<1x8x32xf32>
    tpu.vector_store %arg6[%c0_10, %c0_11, %c0_12], %13 {strides = array<i32>} : memref<1x8x32xf32, #tpu.memory_space<vmem>>, vector<1x8x32xf32>,
    return
  }
  func.func @transform_0(%arg0: i32, %arg1: i32) -> (i32, i32, i32) {
    %c0_i32 = arith.constant 0 : i32
    %c0_i32_0 = arith.constant 0 : i32
    return %arg0, %arg1, %c0_i32 : i32, i32, i32
  }
  func.func @transform_1(%arg0: i32, %arg1: i32) -> (i32, i32) {
    %c0_i32 = arith.constant 0 : i32
    %c0_i32_0 = arith.constant 0 : i32
    %c0_i32_1 = arith.constant 0 : i32
    return %c0_i32, %c0_i32_0 : i32, i32
  }
  func.func @transform_2(%arg0: i32, %arg1: i32) -> (i32, i32) {
    %c0_i32 = arith.constant 0 : i32
    %c0_i32_0 = arith.constant 0 : i32
    %c0_i32_1 = arith.constant 0 : i32
    return %c0_i32, %c0_i32_0 : i32, i32
  }
  func.func @transform_3(%arg0: i32, %arg1: i32) -> (i32, i32) {
    %c0_i32 = arith.constant 0 : i32
    %c0_i32_0 = arith.constant 0 : i32
    %c0_i32_1 = arith.constant 0 : i32
    return %c0_i32, %c0_i32_0 : i32, i32
  }
  func.func @transform_4(%arg0: i32, %arg1: i32) -> (i32, i32, i32) {
    %c0_i32 = arith.constant 0 : i32
    %c0_i32_0 = arith.constant 0 : i32
    return %arg0, %arg1, %c0_i32 : i32, i32, i32
  }
}

</mosaic_0001>

<bundles_post_ra>
// kernel: tpu_custom_call.1
= control target key start
LH: loop header
LB: loop body
LE: loop exit
PB: predicated region body
PF: predicated region fallthrough
CT: control target
= control target key end

     0   :  { %9 = vsyncpa [#allocation3], 0  ;;  %s1053_s0 = inlined_call_operand.hbm [shape: bf16[2,16,32], index: 0, kind: input, shape index: {}]   ;;  %s1054_s1 = inlined_call_operand.hbm [shape: bf16[32,32], index: 1, kind: input, shape index: {}]   ;;  %s1055_s2 = inlined_call_operand.vmem [shape: f32[1,32], index: 2, kind: input, shape index: {}]   ;;  %s1056_s3 = inlined_call_operand.vmem [shape: f32[8,16], index: 3, kind: input, shape index: {}]   ;;  %s1057_s4 = inlined_call_operand.hbm [shape: f32[2,8,32], index: 4, kind: output, shape index: {}]  }
   0x1   :  { %11 = vsyncpa [#allocation3 + $0x1], 0 }
   0x2   :  { %12 = vsyncpa [#allocation6], 0 }
   0x3   :  { %13 = vsyncpa [#allocation4], 0 }
   0x4   :  { %15 = vsyncpa [#allocation4 + $0x1], 0  ;;  %s818_s15 = smov 0   ;;  %s820_s16 = smov 0  }
   0x5   :  { %s822_s17 = smov 0   ;;  %s824_s18 = smov 0  }
   0x6   :  { %s826_s19 = smov 0   ;;  %s828_s20 = smov 0  }
   0x7 LB: > { %s511_s21 = sadd.s32 4294967295, %s783_s20   ;;  %s512_s22 = sadd.s32 4294967294, %s783_s20   ;;  %s783_s20 = sphi %s828_s20, %s21_s20   ;;  %s779_s19 = sphi %s826_s19, %s1081_s19   ;;  %s775_s18 = sphi %s824_s18, %s1080_s18   ;;  %s771_s17 = sphi %s822_s17, %s1079_s17   ;;  %s767_s16 = sphi %s820_s16, %s1078_s16   ;;  %s763_s15 = sphi %s818_s15, %s1077_s15  }
   0x8   : > { %p55_p0 = scmp.ne.s32.totalorder %s767_s16, %s763_s15  ;;  %p852_p1 = scmp.eq.s32.totalorder %s511_s21, 0 }
   0x9   : > { %p856_p2 = scmp.eq.s32.totalorder %s511_s21, 1  ;;  %p150_p3 = scmp.eq.s32.totalorder %s512_s22, 1 }
   0xa   : > { %s1062_s23 = scalar_select %p852_p1, 1, 0 }
   0xb   : > { %s1063_s24 = scalar_select %p856_p2, 1, 0 }
   0xc   : > { %p862_p4 = por %p852_p1, %p55_p0  ;;  %p513_p5 = scmp.ge.s32.totalorder %s783_s20, 1 }
   0xd   : > { %p867_p6 = por %p150_p3, %p55_p0  ;;  %p157_p7 = scmp.lt.s32.totalorder %s783_s20, 3 }
   0xe   : > { %s1064_s25 = scalar_select %p862_p4, 1, 0 }
   0xf   : > { %s1065_s26 = scalar_select %p867_p6, 1, 0 }
  0x10   : > { %p872_p8 = pnand %p513_p5, %p157_p7  ;;  %s785_s28 = smov [#allocation5]  }
  0x11   : > { %s169_s29 = sshll.u32 %s785_s28, 4  ;;  %s33_s5 = sadd.s32 1, %s779_s19  ;;  %s170_s29 = int_to_ptr.vmem [resolvable:$true] %s169_s29 }
  0x12   : > { %s1066_s27 = scalar_select %p872_p8, 1, 0 }
  0x13   : > { %p566_p9 = pneg %p872_p8  ;;  %s639_s8 = scalar_lea.hbm %s1054_s1, 256 }
  0x14   : > { %p640_p12 = scmp.ne.s32.totalorder %s1054_s1, %s639_s8  ;;  %p646_p5 = scmp.lt.u32.totalorder %s639_s8, %s1054_s1 }
  0x15   : > { %p881_p11 = pnand %p566_p9, %p852_p1 }
  0x17   : > { %p641_p13 = pneg %p881_p11 }
  0x19   : > { %p642_p0 = pnand %p641_p13, %p640_p12 }
  0x1b   : > { %p643_p3 = pneg %p642_p0 }
  0x1d   : > { %p648_p7 = pnand %p646_p5, %p643_p3 }
  0x1f   : > { %651 = shalt.err (!%p648_p7)
}
  0x20   : > { %s652_s13 = scalar_lea.vmem %s170_s29, 256  ;;  %p660_p1 = scmp.lt.s32.totalorder %s170_s29, %s170_s29 }
  0x21   : > { %p653_p9 = scmp.ne.s32.totalorder %s170_s29, %s652_s13  ;;  %p661_p4 = scmp.lt.s32.totalorder %s652_s13, %s652_s13 }
  0x23   : > { %p655_p10 = pnand %p653_p9, %p641_p13  ;;  %p662_p8 = por %p661_p4, %p660_p1 }
  0x25   : > { %p656_p6 = pneg %p655_p10 }
  0x27   : > { %p663_p2 = pnand %p662_p8, %p656_p6 }
  0x29   : > { %666 = shalt.err (!%p663_p2)
}
  0x2a   : > { %s786_s14 = smov 64   ;;  %s787_s21 = smov 4  }
  0x2b   : > { %569 = dma.hbm_to_vmem [thread:$0]  (!%p881_p11), %s1054_s1, 256, %s170_s29, [#allocation6], %s786_s14, %s786_s14, %s787_s21  }
  0x2c   : > { %p35_p1 = scmp.ge.s32.totalorder %s33_s5, 2  ;;  %s42_s6 = sadd.s32 1, %s771_s17 }
  0x2d   : > { %p49_p2 = scmp.ne.s32.totalorder %s771_s17, %s767_s16  ;;  %p50_p4 = scmp.eq.s32.totalorder %s783_s20, 0 }
  0x2e   : > { %s1083_s5 = smov (%p35_p1, %s33_s5), 0  ;;  %p1069_p8 = scmp.ne.s32.totalorder %s1063_s24, 0 }
  0x2f   : > { %p911_p6 = por %p50_p4, %p49_p2  ;;  %s37_s8 = ssub.s32 %s779_s19, %s1083_s5 }
  0x30   : > { %p917_p10 = por %p1069_p8, %p49_p2  ;;  %p579_p12 = scmp.lt.s32.totalorder %s783_s20, 2 }
  0x31   : > { %p40_p11 = scmp.eq.s32.totalorder %s37_s8, 0  ;;  %s189_s29 = sand.u32 1, %s771_s17  }
  0x32   : > { %s516_s9 = sshll.u32 %s189_s29, 3  ;;  %s533_s11 = sshll.u32 %s779_s19, 7 }
  0x33   : > { %s926_s10 = scalar_select %p40_p11, %s771_s17, %s42_s6  }
  0x34   : > { %s932_s22 = scalar_lea.hbm %s1053_s0, %s533_s11  ;;  %s193_s24 = scalar_lea.vmem [#allocation2], %s516_s9 }
  0x35   : > { %s202_s28 = sshll.u32 %s193_s24, 4  ;;  %p938_p13 = pnand %p579_p12, %p911_p6  ;;  %s934_s28 = int_to_ptr.vmem [resolvable:$true] %s202_s28 }
  0x36   : > { %s942_s6 = scalar_lea.sflag [#allocation3], %s189_s29  ;;  %s667_s12 = scalar_lea.hbm %s932_s22, 128 }
  0x37   : > { %p668_p0 = scmp.ne.s32.totalorder %s932_s22, %s667_s12  ;;  %p669_p3 = pneg %p938_p13 }
  0x38   : > { %s672_s7 = scalar_lea.hbm %s1053_s0, 256  ;;  %p673_p9 = scmp.lt.u32.totalorder %s932_s22, %s1053_s0 }
  0x39   : > { %p670_p5 = pnand %p669_p3, %p668_p0  ;;  %p674_p1 = scmp.lt.u32.totalorder %s672_s7, %s667_s12 }
  0x3a   : > { %p676_p4 = scmp.lt.u32.totalorder %s667_s12, %s932_s22 }
  0x3b   : > { %p671_p7 = pneg %p670_p5  ;;  %p675_p2 = por %p674_p1, %p673_p9 }
  0x3d   : > { %p677_p6 = por %p676_p4, %p675_p2 }
  0x3f   : > { %p678_p8 = pnand %p677_p6, %p671_p7 }
  0x41   : > { %681 = shalt.err (!%p678_p8)
}
  0x42   : > { %s682_s29 = scalar_lea.vmem %s934_s28, 128  ;;  %s788_s9 = smov [#allocation2]  }
  0x43   : > { %p683_p12 = scmp.ne.s32.totalorder %s934_s28, %s682_s29  ;;  %s687_s11 = sshll.u32 %s788_s9, 4  ;;  %s688_s11 = int_to_ptr.vmem [resolvable:$false] %s687_s11 }
  0x44   : > { %s689_s13 = scalar_lea.vmem %s688_s11, 256  ;;  %p690_p5 = scmp.lt.s32.totalorder %s934_s28, %s688_s11 }
  0x45   : > { %p685_p11 = pnand %p683_p12, %p669_p3  ;;  %p691_p9 = scmp.lt.s32.totalorder %s689_s13, %s682_s29 }
  0x47   : > { %p686_p0 = pneg %p685_p11  ;;  %p692_p1 = por %p691_p9, %p690_p5 }
  0x49   : > { %p693_p2 = pnand %p692_p1, %p686_p0 }
  0x4b   : > { %696 = shalt.err (!%p693_p2)
}
  0x4c   : > { %573 = dma.hbm_to_vmem [thread:$0]  (!%p938_p13), %s932_s22, 128, %s934_s28, %s942_s6, %s786_s14, %s786_s14, %s787_s21  }
  0x4d   : > { %p1072_p3 = scmp.ne.s32.totalorder %s1066_s27, 0 }
  0x4e   : > { %s976_s12 = sand.u32 (!%p1072_p3), 1, %s767_s16   ;;  %p1073_p7 = scmp.ne.s32.totalorder (!%p1072_p3), %s1064_s25, 0 }
  0x4f   : > { %214 = sbr.rel (%p1072_p3) target bundleno = 548 (0x224), region = 36  ;;  %s520_s7 = sshll.u32 (!%p1072_p3), %s976_s12, 3 }
  0x50   : > { %s217_s24 = scalar_lea.sflag (!%p1072_p3), [#allocation3], %s976_s12  ;;  %s220_s8 = scalar_lea.vmem (!%p1072_p3), [#allocation2], %s520_s7 }
  0x56   : > { %750 = dma.done.wait (%p1073_p7), %s217_s24, 128  }
  0x57   : > { %752 = vsyncadd (%p1073_p7), %s217_s24, 4294967168  ;;  %p1074_p13 = scmp.ne.s32.totalorder %s1062_s23, 0 }
  0x59   : > { %754 = dma.done.wait (%p1074_p13), [#allocation6], 256  }
  0x5a   : > { %756 = vsyncadd (%p1074_p13), [#allocation6], 4294967040  ;;  %v789_v0 = vmov 0.0   ;;  %vm790_vm0 = vmmov 0   ;;  %v636_v1 = vld [vmem:[#allocation5] sm:$0xff]   ;;  %v637_v2 = vld [vmem:[#allocation5 + $0x8] sm:$0xff]  }
  0x5b   : > { %540 = vmatprep.subr.bf16.mxu0 %v789_v0  ;;  %544 = vmatprep.mubr.msk.bf16.mxu0 %vm790_vm0, %v789_v0  ;;  %v638_v3 = vld [vmem:[%s220_s8] sm:$0xff]   ;;  %vm281_vm1 = vcmask 261120   ;;  %v791_v4 = vmov 0.0|0.0   ;;  %vm329_vm2 = vcmask 130048   ;;  %s530_s21 = sshll.u32 %s775_s18, 7  ;;  %s248_s22 = scalar_lea.vmem [#allocation7], %s520_s7 }
  0x5c   : > { %552 = vmatprep.mubr.msk.f32.mxu1 %vm790_vm0, %v789_v0  ;;  %541 = vmatpush3.bf16.msra.mxu0 %v636_v1  ;;  %v523_v5 = vld [vmem:[%s1055_s2] ss:$0 sm:$0xff]  ;;  %s419_s28 = sshll.u32 %s248_s22, 4  ;;  %s1003_s9 = scalar_lea.hbm %s1057_s4, %s530_s21  ;;  %s1005_s28 = int_to_ptr.vmem [resolvable:$true] %s419_s28 }
  0x5d   : > { %542 = vmatprep.subr.bf16.mxu0 %v789_v0  ;;  %555 = vmatprep.subr.bf16.mxu1 %v791_v4  ;;  %v328_v15 = vld [vmem:[%s1056_s3] sm:$0xff]  ;;  %s405_s11 = scalar_lea.sflag [#allocation4], %s976_s12  ;;  %s697_s13 = scalar_lea.vmem %s1005_s28, 128 }
  0x5e   : > { %p698_p4 = scmp.ne.s32.totalorder %s1005_s28, %s697_s13  ;;  %s792_s18 = smov [#allocation7]  }
  0x5f   : > { %s701_s7 = sshll.u32 %s792_s18, 4  ;;  %s702_s7 = int_to_ptr.vmem [resolvable:$false] %s701_s7 }
  0x60   : > { %543 = vmatpush3.bf16.msra.mxu0 %v637_v2  ;;  %p699_p6 = pnand %p698_p4, %p917_p10  ;;  %s703_s24 = scalar_lea.vmem %s702_s7, 256 }
  0x61   : > { %p704_p12 = scmp.lt.s32.totalorder %s1005_s28, %s702_s7  ;;  %p705_p11 = scmp.lt.s32.totalorder %s703_s24, %s697_s13 }
  0x62   : > { %p700_p8 = pneg %p699_p6 }
  0x63   : > { %545 = vmatmul.mubr.msk.bf16.vlgmr.msra.gmra.mrb[0].mxu0 %vm281_vm1, %v638_v3  ;;  %p706_p0 = por %p705_p11, %p704_p12 }
  0x65   : > { %p707_p5 = pnand %p706_p0, %p700_p8 }
 0x136   : > { %v319_v6 = vpop.f32.mrb[0].mxu0 }
 0x137   : > { %v320_v7 = vadd.f32 %v523_v5, %v319_v6  ;;  %v546_v8 = vpop.f32.mrb[1].mxu0 }
 0x138   : > { %v322_v9 = vpop.f32.mrb[2].mxu0 }
 0x139   : > { %v323_v10 = vadd.f32 %v523_v5, %v322_v9  ;;  %v547_v11 = vpop.f32.mrb[3].mxu0  ;;  %v326_v12 = vmax.f32 %v320_v7, 0.0 }
 0x13b   : > { %v327_v13 = vmax.f32 %v323_v10, 0.0 }
 0x13d   : > { %v556_v14 = vpack.c.bf16 %v327_v13, %v326_v12 }
 0x13f   : > { %557 = vmatpush3.bf16.msra.mxu1 %v556_v14 }
 0x142   : > { %553 = vmatmul.mubr.msk.f32.vlgmr.msra.gmra.mrb[0].mxu1 %vm329_vm2, %v328_v15 }
 0x215   : > { %v399_v16 = vpop.f32.mrb[0].mxu1 }
 0x216   : > { %403 = vst.msk [vmem:[%s248_s22] sm:$0xff] %vm281_vm1, %v399_v16  ;;  %v554_v17 = vpop.f32.mrb[1].mxu1 }
 0x217   : > { %710 = shalt.err (!%p707_p5)
}
 0x218   : > { %s711_s12 = scalar_lea.hbm %s1003_s9, 128  ;;  %s715_s23 = scalar_lea.hbm %s1057_s4, 256 }
 0x219   : > { %p712_p9 = scmp.ne.s32.totalorder %s1003_s9, %s711_s12  ;;  %p716_p3 = scmp.lt.u32.totalorder %s1003_s9, %s1057_s4 }
 0x21a   : > { %p717_p7 = scmp.lt.u32.totalorder %s715_s23, %s711_s12  ;;  %p719_p4 = scmp.lt.u32.totalorder %s711_s12, %s1003_s9 }
 0x21b   : > { %p713_p1 = pnand %p712_p9, %p917_p10 }
 0x21c   : > { %p718_p13 = por %p717_p7, %p716_p3 }
 0x21d   : > { %p714_p2 = pneg %p713_p1 }
 0x21e   : > { %p720_p6 = por %p719_p4, %p718_p13 }
 0x220   : > { %p721_p8 = pnand %p720_p6, %p714_p2 }
 0x222   : > { %724 = shalt.err (!%p721_p8)
}
 0x223   : > { %564 = dma.vmem_to_hbm [thread:$0]  (%p917_p10), %s1005_s28, 128, %s1003_s9, %s405_s11  }
 0x224 PF: > { %s431_s21 = sand.u32 1, %s763_s15   ;;  %p1075_p12 = scmp.ne.s32.totalorder %s1065_s26, 0 }
 0x225   : > { %p1076_p11 = scmp.ge.s32.totalorder %s783_s20, 2  ;;  %s432_s22 = scalar_lea.sflag [#allocation4], %s431_s21 }
 0x227   : > { %p575_p0 = pnand %p1076_p11, %p1075_p12 }
 0x229   : > { %758 = dma.done.wait (!%p575_p0), %s432_s22, 128  }
 0x22a   : > { %760 = vsyncadd (!%p575_p0), %s432_s22, 4294967168  ;;  %s21_s20 = sadd.s32 1, %s783_s20   ;;  %s1077_s15 = smov %s767_s16 }
 0x22b   : > { %p18_p5 = scmp.ge.s32.totalorder %s21_s20, 4   ;;  %s1078_s16 = smov %s771_s17 }
 0x22c   : > { %s1079_s17 = smov %s926_s10  ;;  %s1080_s18 = smov %s779_s19 }
 0x22d   : > { %s1081_s19 = smov %s1083_s5  ;;  %20 = sbr.rel (!%p18_p5) target bundleno = 7 (0x7), region = 85 }
 0x234   :  { %437 = vsyncpa [#allocation3], 1 }
 0x235   :  { %439 = vsyncpa [#allocation3 + $0x1], 1 }
 0x236   :  { %440 = vsyncpa [#allocation6], 1 }
 0x237   :  { %441 = vsyncpa [#allocation4], 1 }
 0x238   :  { %443 = vsyncpa [#allocation4 + $0x1], 1 }

</bundles_post_ra>
